<compile_context>
chip_gen: v6e
topology: v6e:2x2x1
jax: 0.10.0
libtpu: 0.0.40
codegen_flags: <defaults>
</compile_context>

<pallas_src>
import functools
import math

import jax
import jax.numpy as jnp
from jax.experimental import pallas as pl
from jax.experimental.pallas import tpu as pltpu


def _arcface_kernel(x_ref, w_ref, inv_wn_ref, s_inv_xn_ref, label_ref, o_ref, *,
                    s, cos_m, sin_m, th, mm, easy_margin, matmul_dtype):
    x = x_ref[...]                    # (TB, D)  f32
    w = w_ref[...]                    # (TC, D)  f32
    inv_wn = inv_wn_ref[...]          # (1, TC)  f32   1/||w_c||
    s_inv_xn = s_inv_xn_ref[...]      # (TB, 1)  f32   s/||x_b||
    label = label_ref[...]            # (TB, 1)  int32

    # Un-normalized matmul on the MXU, contracting the feature dim of BOTH
    # operands directly -> no transpose of the streamed weight tile.
    if matmul_dtype is not None:
        xm = x.astype(matmul_dtype)
        wm = w.astype(matmul_dtype)
    else:
        xm, wm = x, w
    raw = jax.lax.dot_general(
        xm, wm,
        dimension_numbers=(((1,), (1,)), ((), ())),
        preferred_element_type=jnp.float32)             # (TB, TC)

    # s * cosine, normalization fully folded into the two per-row/per-class
    # scale vectors (rsqrt precomputed in the wrapper; no full-tile * s).
    cosine_s = raw * s_inv_xn * inv_wn                   # (TB, TC) == s*cos

    # Global column ids for this C tile (C tiles are grid axis 0).
    tile_c = o_ref.shape[-1]
    col0 = pl.program_id(0) * tile_c
    col_ids = col0 + jax.lax.broadcasted_iota(jnp.int32, cosine_s.shape, 1)
    is_target = col_ids == label                         # (TB, TC) bool

    # Margin math only on the (TB, 1) label-column cosine (0.0 if the label
    # lives in a different C tile -> harmless, never selected there).
    cos_t = jnp.sum(jnp.where(is_target, cosine_s, 0.0),
                    axis=-1, keepdims=True) * (1.0 / s)  # (TB, 1)
    sin_t = jnp.sqrt(jnp.maximum(1.0 - cos_t * cos_t, 0.0))
    phi_t = cos_t * cos_m - sin_t * sin_m
    if easy_margin:
        phi_t = jnp.where(cos_t > 0.0, phi_t, cos_t)
    else:
        phi_t = jnp.where(cos_t > th, phi_t, cos_t - mm)

    # Single fused select (both branches are already scaled by s).
    o_ref[...] = jnp.where(is_target, phi_t * s, cosine_s).astype(o_ref.dtype)


def _round_up(v, m):
    return (v + m - 1) // m * m


def _vmem_capacity_bytes():
    try:
        cap = int(pltpu.get_tpu_info().vmem_capacity_bytes)
    except Exception:
        cap = 64 << 20                      # conservative fallback (v7x per-TC)
    # Guard against a per-chip (rather than per-TensorCore) report on v7x,
    # whose per-TC VMEM is 64 MiB.
    try:
        kind = jax.devices()[0].device_kind.lower()
        if "v7" in kind:
            cap = min(cap, 64 << 20)
    except Exception:
        pass
    return min(cap, 128 << 20)


def _choose_tiles(B, C, D, cap):
    """Biggest tiles that fit the (double-buffered) VMEM budget."""
    budget = max(32 << 20, cap - (20 << 20))   # slack for layout padding etc.

    def step_bytes(tb, tc):
        # f32 bytes resident per grid step (everything double-buffered):
        #   weight tile + output tile + inv_wn (sublane-padded to 8 rows)
        #   + x tile + label & s_inv_xn (lane-padded to 128 cols).
        return 4 * (2 * tc * D + 2 * tb * tc + 2 * 8 * tc
                    + 2 * tb * D + 4 * tb * 128)

    tile_b = min(_round_up(B, 8), 512)
    tile_c = min(_round_up(C, 256), 16384)
    while tile_c > 256 and step_bytes(tile_b, tile_c) > budget:
        tile_c -= 256                         # v6e/v7x MXU is 256 wide
    while tile_b > 8 and step_bytes(tile_b, tile_c) > budget:
        tile_b = max(8, tile_b // 2)
    tile_c = min(tile_c, _round_up(C, 128))   # never bigger than one C sweep
    tile_b = min(tile_b, _round_up(B, 8))
    return tile_b, tile_c, step_bytes(tile_b, tile_c)


def arcface_forward(x, weight, label, *, s=64.0, m=0.5, easy_margin=False,
                    matmul_dtype=None):
    """x: (B, D) f32, weight: (C, D) f32, label: (B,) int -> (B, C) f32."""
    B, D = x.shape
    C, D2 = weight.shape
    assert D == D2, "feature dims must match"

    cap = _vmem_capacity_bytes()
    tile_b, tile_c, step_bytes = _choose_tiles(B, C, D, cap)

    x = x.astype(jnp.float32)
    weight = weight.astype(jnp.float32)
    label2 = label.astype(jnp.int32).reshape(B, 1)

    # Per-class inverse norm and per-row (s * inverse norm), computed once in
    # the wrapper from the ORIGINAL (un-padded) arrays.  Matches
    # F.normalize's clamp_min(1e-12) on the norm.
    inv_wn = jax.lax.rsqrt(
        jnp.maximum(jnp.sum(weight * weight, axis=1), 1e-24)).reshape(1, C)
    s_inv_xn = (float(s) * jax.lax.rsqrt(
        jnp.maximum(jnp.sum(x * x, axis=1), 1e-24))).reshape(B, 1)

    kernel = functools.partial(
        _arcface_kernel,
        s=float(s), cos_m=math.cos(m), sin_m=math.sin(m),
        th=math.cos(math.pi - m), mm=math.sin(math.pi - m) * m,
        easy_margin=easy_margin, matmul_dtype=matmul_dtype)

    # Grid: C tiles OUTER (axis 0), B tiles INNER (axis 1) so the streamed
    # weight tile stays resident in VMEM across all B tiles (W is read from
    # HBM exactly once), and the big C axis is what megacore splits.
    grid = (pl.cdiv(C, tile_c), pl.cdiv(B, tile_b))
    vmem_limit = int(min(cap - (8 << 20),
                         max(32 << 20, 2 * step_bytes)))

    out = pl.pallas_call(
        kernel,
        out_shape=jax.ShapeDtypeStruct((B, C), jnp.float32),
        grid_spec=pltpu.PrefetchScalarGridSpec(
            num_scalar_prefetch=0,
            grid=grid,
            in_specs=[
                pl.BlockSpec((tile_b, D), lambda j, i: (i, 0)),   # x
                pl.BlockSpec((tile_c, D), lambda j, i: (j, 0)),   # weight
                pl.BlockSpec((1, tile_c), lambda j, i: (0, j)),   # 1/||w||
                pl.BlockSpec((tile_b, 1), lambda j, i: (i, 0)),   # s/||x||
                pl.BlockSpec((tile_b, 1), lambda j, i: (i, 0)),   # label
            ],
            out_specs=pl.BlockSpec((tile_b, tile_c), lambda j, i: (i, j)),
        ),
        compiler_params=pltpu.CompilerParams(
            dimension_semantics=("parallel", "parallel"),
            vmem_limit_bytes=vmem_limit,
        ),
    )(x, weight, inv_wn, s_inv_xn, label2)

    return out


def _xavier_uniform(key, shape):
    # nn.init.xavier_uniform_ for a (out_features, in_features) matrix
    fan_out, fan_in = shape
    bound = math.sqrt(6.0 / (fan_in + fan_out))
    return jax.random.uniform(key, shape, jnp.float32, -bound, bound)


if __name__ == "__main__":
    B = 8
    in_features = 64
    out_features = 256

    key = jax.random.PRNGKey(0)
    kx, kw, kl = jax.random.split(key, 3)

    x = jax.random.normal(kx, (B, in_features), dtype=jnp.float32)
    weight = _xavier_uniform(kw, (out_features, in_features))
    label = jax.random.randint(kl, (B,), 0, out_features, dtype=jnp.int32)

    # TODO(synk): the PyTorch device_id!=None multi-GPU chunked path is a
    # model-parallel data-movement scheme with no single-device equivalent.
    out = arcface_forward(x, weight, label, s=64.0, m=0.5, easy_margin=False)
    out = jax.block_until_ready(out)

    # Pure-JAX reference mirroring the PyTorch forward.
    def ref(x, w, label, s=64.0, m=0.5):
        xn = x / jnp.maximum(jnp.linalg.norm(x, axis=1, keepdims=True), 1e-12)
        wn = w / jnp.maximum(jnp.linalg.norm(w, axis=1, keepdims=True), 1e-12)
        cos = xn @ wn.T
        sin = jnp.sqrt(jnp.maximum(1.0 - cos * cos, 0.0))
        phi = cos * math.cos(m) - sin * math.sin(m)
        phi = jnp.where(cos > math.cos(math.pi - m), phi,
                        cos - math.sin(math.pi - m) * m)
        oh = jax.nn.one_hot(label, w.shape[0], dtype=jnp.float32)
        return (oh * phi + (1.0 - oh) * cos) * s

    expected = ref(x, weight, label)
    assert out.shape == expected.shape
    assert jnp.allclose(out, expected, atol=2e-3, rtol=2e-3), \
        "mismatch vs reference"

    print("KERNEL_OK")
</pallas_src>

<mosaic_0001>
module attributes {stable_mosaic.version = 11 : i64} {
  func.func @_arcface_kernel(%arg0: i32, %arg1: i32, %arg2: memref<8x64xf32, #tpu.memory_space<vmem>>, %arg3: memref<256x64xf32, #tpu.memory_space<vmem>>, %arg4: memref<1x256xf32, #tpu.memory_space<vmem>>, %arg5: memref<8x1xf32, #tpu.memory_space<vmem>>, %arg6: memref<8x1xi32, #tpu.memory_space<vmem>>, %arg7: memref<8x256xf32, #tpu.memory_space<vmem>>) attributes {dimension_semantics = [#tpu.dimension_semantics<parallel>, #tpu.dimension_semantics<parallel>], iteration_bounds = array<i64: 1, 1>, scalar_prefetch = 0 : i64, scratch_operands = 0 : i64, tpu.core_type = #tpu.core_type<tc>, window_params = [{transform_indices = @transform_0, window_bounds = array<i64: 8, 64>}, {transform_indices = @transform_1, window_bounds = array<i64: 256, 64>}, {transform_indices = @transform_2, window_bounds = array<i64: 1, 256>}, {transform_indices = @transform_3, window_bounds = array<i64: 8, 1>}, {transform_indices = @transform_4, window_bounds = array<i64: 8, 1>}, {transform_indices = @transform_5, window_bounds = array<i64: 8, 256>}]} {
    %c0 = arith.constant 0 : index
    %c0_0 = arith.constant 0 : index
    %0 = vector.load %arg2[%c0, %c0_0] : memref<8x64xf32, #tpu.memory_space<vmem>>, vector<8x64xf32>
    %c0_1 = arith.constant 0 : index
    %c0_2 = arith.constant 0 : index
    %1 = vector.load %arg3[%c0_1, %c0_2] : memref<256x64xf32, #tpu.memory_space<vmem>>, vector<256x64xf32>
    %c0_3 = arith.constant 0 : index
    %c0_4 = arith.constant 0 : index
    %2 = vector.load %arg4[%c0_3, %c0_4] : memref<1x256xf32, #tpu.memory_space<vmem>>, vector<1x256xf32>
    %c0_5 = arith.constant 0 : index
    %c0_6 = arith.constant 0 : index
    %3 = vector.load %arg5[%c0_5, %c0_6] : memref<8x1xf32, #tpu.memory_space<vmem>>, vector<8x1xf32>
    %c0_7 = arith.constant 0 : index
    %c0_8 = arith.constant 0 : index
    %4 = vector.load %arg6[%c0_7, %c0_8] : memref<8x1xi32, #tpu.memory_space<vmem>>, vector<8x1xi32>
    %cst = arith.constant dense<0.000000e+00> : vector<8x256xf32>
    %5 = tpu.matmul %0, %1, %cst {dimension_numbers = #tpu.dot_dimension_numbers<[1], [1], [0], [0], [0, 0, 1, 0], [], []>} : vector<8x64xf32>, vector<256x64xf32>, vector<8x256xf32> -> vector<8x256xf32>
    %6 = vector.broadcast %3 : vector<8x1xf32> to vector<8x256xf32>
    %7 = arith.mulf %5, %6 : vector<8x256xf32>
    %8 = vector.broadcast %2 : vector<1x256xf32> to vector<8x256xf32>
    %9 = arith.mulf %7, %8 : vector<8x256xf32>
    %c256_i32 = arith.constant 256 : i32
    %10 = arith.muli %arg0, %c256_i32 : i32
    %11 = tpu.iota {dimensions = array<i32: 1>} : vector<8x256xi32>
    %12 = vector.broadcast %10 : i32 to vector<8x256xi32>
    %13 = arith.addi %12, %11 : vector<8x256xi32>
    %14 = vector.broadcast %4 : vector<8x1xi32> to vector<8x256xi32>
    %15 = arith.cmpi eq, %13, %14 : vector<8x256xi32>
    %cst_9 = arith.constant 0.000000e+00 : f32
    %16 = vector.broadcast %cst_9 : f32 to vector<8x256xf32>
    %17 = arith.select %15, %9, %16 : vector<8x256xi1>, vector<8x256xf32>
    %cst_10 = arith.constant dense<0.000000e+00> : vector<8xf32>
    %18 = vector.multi_reduction <add>, %17, %cst_10 [1] : vector<8x256xf32> to vector<8xf32>
    %19 = vector.shape_cast %18 : vector<8xf32> to vector<8x1xf32>
    %cst_11 = arith.constant 1.562500e-02 : f32
    %20 = vector.broadcast %cst_11 : f32 to vector<8x1xf32>
    %21 = arith.mulf %19, %20 : vector<8x1xf32>
    %22 = arith.mulf %21, %21 : vector<8x1xf32>
    %cst_12 = arith.constant 1.000000e+00 : f32
    %23 = vector.broadcast %cst_12 : f32 to vector<8x1xf32>
    %24 = arith.subf %23, %22 : vector<8x1xf32>
    %cst_13 = arith.constant 0.000000e+00 : f32
    %25 = vector.broadcast %cst_13 : f32 to vector<8x1xf32>
    %26 = arith.maximumf %24, %25 : vector<8x1xf32>
    %27 = math.sqrt %26 : vector<8x1xf32>
    %cst_14 = arith.constant 0.87758255 : f32
    %28 = vector.broadcast %cst_14 : f32 to vector<8x1xf32>
    %29 = arith.mulf %21, %28 : vector<8x1xf32>
    %cst_15 = arith.constant 0.47942555 : f32
    %30 = vector.broadcast %cst_15 : f32 to vector<8x1xf32>
    %31 = arith.mulf %27, %30 : vector<8x1xf32>
    %32 = arith.subf %29, %31 : vector<8x1xf32>
    %cst_16 = arith.constant -0.87758255 : f32
    %33 = vector.broadcast %cst_16 : f32 to vector<8x1xf32>
    %34 = arith.cmpf ogt, %21, %33 : vector<8x1xf32>
    %cst_17 = arith.constant 0.239712775 : f32
    %35 = vector.broadcast %cst_17 : f32 to vector<8x1xf32>
    %36 = arith.subf %21, %35 : vector<8x1xf32>
    %37 = arith.select %34, %32, %36 : vector<8x1xi1>, vector<8x1xf32>
    %cst_18 = arith.constant 6.400000e+01 : f32
    %38 = vector.broadcast %cst_18 : f32 to vector<8x1xf32>
    %39 = arith.mulf %37, %38 : vector<8x1xf32>
    %40 = vector.shape_cast %39 : vector<8x1xf32> to vector<8x1xf32>
    %41 = vector.broadcast %40 : vector<8x1xf32> to vector<8x256xf32>
    %42 = arith.select %15, %41, %9 : vector<8x256xi1>, vector<8x256xf32>
    %c0_19 = arith.constant 0 : index
    %c0_20 = arith.constant 0 : index
    %43 = vector.load %arg7[%c0_19, %c0_20] : memref<8x256xf32, #tpu.memory_space<vmem>>, vector<8x256xf32>
    tpu.vector_store %arg7[%c0_19, %c0_20], %42 {strides = array<i32>} : memref<8x256xf32, #tpu.memory_space<vmem>>, vector<8x256xf32>,
    return
  }
  func.func @transform_0(%arg0: i32, %arg1: i32) -> (i32, i32) {
    %c0_i32 = arith.constant 0 : i32
    %c0_i32_0 = arith.constant 0 : i32
    return %arg1, %c0_i32 : i32, i32
  }
  func.func @transform_1(%arg0: i32, %arg1: i32) -> (i32, i32) {
    %c0_i32 = arith.constant 0 : i32
    %c0_i32_0 = arith.constant 0 : i32
    return %arg0, %c0_i32 : i32, i32
  }
  func.func @transform_2(%arg0: i32, %arg1: i32) -> (i32, i32) {
    %c0_i32 = arith.constant 0 : i32
    %c0_i32_0 = arith.constant 0 : i32
    return %c0_i32, %arg0 : i32, i32
  }
  func.func @transform_3(%arg0: i32, %arg1: i32) -> (i32, i32) {
    %c0_i32 = arith.constant 0 : i32
    %c0_i32_0 = arith.constant 0 : i32
    return %arg1, %c0_i32 : i32, i32
  }
  func.func @transform_4(%arg0: i32, %arg1: i32) -> (i32, i32) {
    %c0_i32 = arith.constant 0 : i32
    %c0_i32_0 = arith.constant 0 : i32
    return %arg1, %c0_i32 : i32, i32
  }
  func.func @transform_5(%arg0: i32, %arg1: i32) -> (i32, i32) {
    %c0_i32 = arith.constant 0 : i32
    return %arg1, %arg0 : i32, i32
  }
}

</mosaic_0001>

<bundles_post_ra>
// kernel: tpu_custom_call.1
= control target key start
LH: loop header
LB: loop body
LE: loop exit
PB: predicated region body
PF: predicated region fallthrough
CT: control target
= control target key end

     0   :  { %vm57_vm0 = vcmask 523264   ;;  %v396_v3 = vmov 0   ;;  %s577_s0 = inlined_call_operand.vmem [shape: f32[8,64], index: 0, kind: input, shape index: {}]   ;;  %s578_s1 = inlined_call_operand.vmem [shape: f32[256,64], index: 1, kind: input, shape index: {}]   ;;  %s579_s2 = inlined_call_operand.vmem [shape: f32[1,256], index: 2, kind: input, shape index: {}]   ;;  %s580_s3 = inlined_call_operand.vmem [shape: f32[8,1], index: 3, kind: input, shape index: {}]   ;;  %s581_s4 = inlined_call_operand.vmem [shape: s32[8,1], index: 4, kind: input, shape index: {}]   ;;  %s582_s5 = inlined_call_operand.hbm [shape: f32[8,256], index: 5, kind: output, shape index: {}]  }
   0x1   :  { %v53_v0 = vld [vmem:[%s578_s1 + $0xf8] sm:$0xff]  ;;  %v52_v2 = vld [vmem:[%s578_s1 + $0xf0] sm:$0xff]  ;;  %371 = vset.pattern.permute.xlu0 %v396_v3  ;;  %v51_v5 = vld [vmem:[%s578_s1 + $0xe8] sm:$0xff] }
   0x2   :  { %v37_v1 = vld [vmem:[%s578_s1 + $0x78] sm:$0xff]  ;;  %335 = vmatprep.subr.msk.mxu0 %vm57_vm0, %v53_v0  ;;  %v36_v4 = vld [vmem:[%s578_s1 + $0x70] sm:$0xff]  ;;  %v35_v6 = vld [vmem:[%s578_s1 + $0x68] sm:$0xff] }
   0x3   :  { %336 = vmatpush3.xpose.msk.msra.mxu0 %vm57_vm0, %v37_v1  ;;  %v50_v7 = vld [vmem:[%s578_s1 + $0xe0] sm:$0xff]  ;;  %v49_v11 = vld [vmem:[%s578_s1 + $0xd8] sm:$0xff] }
   0x4   :  { %337 = vmatprep.subr.msk.mxu0 %vm57_vm0, %v52_v2  ;;  %v21_v8 = vld [vmem:[%s577_s0] sm:$0xff] }
   0x5   :  { %v34_v9 = vld [vmem:[%s578_s1 + $0x60] sm:$0xff]  ;;  %367 = vmatprep.mubr.msk.f32.mxu0 %vm57_vm0, %v21_v8 }
   0x6   :  { %v55_v10 = vld [vmem:[%s580_s3] sm:$0xff] }
   0x7   :  { %338 = vmatpush3.xpose.msk.msra.mxu0 %vm57_vm0, %v36_v4  ;;  %230 = vperm.xlu0 %371, %v55_v10  }
   0x8   :  { %339 = vmatprep.subr.msk.mxu0 %vm57_vm0, %v51_v5 }
   0xb   :  { %340 = vmatpush3.xpose.msk.msra.mxu0 %vm57_vm0, %v35_v6 }
   0xc   :  { %341 = vmatprep.subr.msk.mxu0 %vm57_vm0, %v50_v7 }
   0xd   :  { %10 = vsyncpa [#allocation3], 0  ;;  %v56_v12 = vld [vmem:[%s581_s4] sm:$0xff]  ;;  %v33_v13 = vld [vmem:[%s578_s1 + $0x58] sm:$0xff]  ;;  %v236_v36 = vlaneseq }
   0xe   :  { %v48_v14 = vld [vmem:[%s578_s1 + $0xd0] sm:$0xff]  ;;  %256 = vperm.xlu0 %371, %v56_v12   ;;  %v47_v16 = vld [vmem:[%s578_s1 + $0xc8] sm:$0xff]  ;;  %v46_v18 = vld [vmem:[%s578_s1 + $0xc0] sm:$0xff] }
   0xf   :  { %342 = vmatpush3.xpose.msk.msra.mxu0 %vm57_vm0, %v34_v9  ;;  %v32_v15 = vld [vmem:[%s578_s1 + $0x50] sm:$0xff]  ;;  %v31_v17 = vld [vmem:[%s578_s1 + $0x48] sm:$0xff]  ;;  %v30_v19 = vld [vmem:[%s578_s1 + $0x40] sm:$0xff]  ;;  %v237_v37 = vshrl.u32 %v236_v36, 7  ;;  %v250_v42 = vand.u32 127, %v236_v36 }
  0x10   :  { %343 = vmatprep.subr.msk.mxu0 %vm57_vm0, %v49_v11  ;;  %v45_v20 = vld [vmem:[%s578_s1 + $0xb8] sm:$0xff]  ;;  %v44_v22 = vld [vmem:[%s578_s1 + $0xb0] sm:$0xff]  ;;  %v43_v24 = vld [vmem:[%s578_s1 + $0xa8] sm:$0xff] }
  0x11   :  { %v29_v21 = vld [vmem:[%s578_s1 + $0x38] sm:$0xff]  ;;  %v28_v23 = vld [vmem:[%s578_s1 + $0x30] sm:$0xff]  ;;  %v27_v25 = vld [vmem:[%s578_s1 + $0x28] sm:$0xff]  ;;  %v238_v38 = vsub.s32 0, %v237_v37  ;;  %v242_v41 = vsub.s32 1, %v237_v37  ;;  %v251_v47 = vadd.s32 128, %v250_v42 }
  0x12   :  { %v42_v26 = vld [vmem:[%s578_s1 + $0xa0] sm:$0xff]  ;;  %v41_v28 = vld [vmem:[%s578_s1 + $0x98] sm:$0xff]  ;;  %v40_v30 = vld [vmem:[%s578_s1 + $0x90] sm:$0xff] }
  0x13   :  { %344 = vmatpush3.xpose.msk.msra.mxu0 %vm57_vm0, %v33_v13  ;;  %v26_v27 = vld [vmem:[%s578_s1 + $0x20] sm:$0xff]  ;;  %v25_v29 = vld [vmem:[%s578_s1 + $0x18] sm:$0xff]  ;;  %v24_v31 = vld [vmem:[%s578_s1 + $0x10] sm:$0xff] }
  0x14   :  { %345 = vmatprep.subr.msk.mxu0 %vm57_vm0, %v48_v14  ;;  %v39_v32 = vld [vmem:[%s578_s1 + $0x88] sm:$0xff]  ;;  %v38_v34 = vld [vmem:[%s578_s1 + $0x80] sm:$0xff] }
  0x15   :  { %v23_v33 = vld [vmem:[%s578_s1 + $0x8] sm:$0xff]  ;;  %v22_v35 = vld [vmem:[%s578_s1] sm:$0xff]  ;;  %s397_s1 = smov [#allocation2]  }
  0x16   :  { %v54_v39 = vld [vmem:[%s579_s2] sm:$0x3]  ;;  %s293_s2 = sshll.u32 %s397_s1, 4  ;;  %s294_s2 = int_to_ptr.vmem [resolvable:$true] %s293_s2 }
  0x17   :  { %346 = vmatpush3.xpose.msk.msra.mxu0 %vm57_vm0, %v32_v15  ;;  %v239_v43 = vrot.slane %v54_v39, %v238_v38  ;;  %v243_v46 = vrot.slane %v54_v39, %v242_v41  ;;  %s374_s9 = scalar_lea.vmem %s294_s2, 256  ;;  %p379_p1 = scmp.lt.s32.totalorder %s294_s2, %s294_s2 }
  0x18   :  { %347 = vmatprep.subr.msk.mxu0 %vm57_vm0, %v47_v16  ;;  %p375_p0 = scmp.ne.s32.totalorder %s294_s2, %s374_s9  ;;  %p380_p2 = scmp.lt.s32.totalorder %s374_s9, %s374_s9 }
  0x1a   :  { %p381_p3 = por %p380_p2, %p379_p1 }
  0x1b   :  { %348 = vmatpush3.xpose.msk.msra.mxu0 %vm57_vm0, %v31_v17 }
  0x1c   :  { %349 = vmatprep.subr.msk.mxu0 %vm57_vm0, %v46_v18  ;;  %p382_p4 = pnand %p381_p3, %p375_p0 }
  0x1f   :  { %350 = vmatpush3.xpose.msk.msra.mxu0 %vm57_vm0, %v30_v19 }
  0x20   :  { %351 = vmatprep.subr.msk.mxu0 %vm57_vm0, %v45_v20 }
  0x23   :  { %352 = vmatpush3.xpose.msk.msra.mxu0 %vm57_vm0, %v29_v21 }
  0x24   :  { %353 = vmatprep.subr.msk.mxu0 %vm57_vm0, %v44_v22 }
  0x27   :  { %354 = vmatpush3.xpose.msk.msra.mxu0 %vm57_vm0, %v28_v23 }
  0x28   :  { %355 = vmatprep.subr.msk.mxu0 %vm57_vm0, %v43_v24 }
  0x2b   :  { %356 = vmatpush3.xpose.msk.msra.mxu0 %vm57_vm0, %v27_v25 }
  0x2c   :  { %357 = vmatprep.subr.msk.mxu0 %vm57_vm0, %v42_v26 }
  0x2f   :  { %358 = vmatpush3.xpose.msk.msra.mxu0 %vm57_vm0, %v26_v27 }
  0x30   :  { %359 = vmatprep.subr.msk.mxu0 %vm57_vm0, %v41_v28 }
  0x33   :  { %360 = vmatpush3.xpose.msk.msra.mxu0 %vm57_vm0, %v25_v29 }
  0x34   :  { %361 = vmatprep.subr.msk.mxu0 %vm57_vm0, %v40_v30 }
  0x37   :  { %362 = vmatpush3.xpose.msk.msra.mxu0 %vm57_vm0, %v24_v31 }
  0x38   :  { %363 = vmatprep.subr.msk.mxu0 %vm57_vm0, %v39_v32 }
  0x3b   :  { %364 = vmatpush3.xpose.msk.msra.mxu0 %vm57_vm0, %v23_v33 }
  0x3c   :  { %365 = vmatprep.subr.msk.mxu0 %vm57_vm0, %v38_v34 }
  0x3f   :  { %366 = vmatpush3.xpose.msk.msra.mxu0 %vm57_vm0, %v22_v35 }
  0x42   :  { %368 = vmatmul.mubr.msk.f32.vlgmr.msra.gmra.mxu0 %vm57_vm0, %v21_v8 }
  0x82   :  { %v231_v40 = vpop.permute.xlu0 %230 }
  0x89   :  { %v257_v50 = vpop.permute.xlu0 %256 }
  0x8a   :  { %vm258_vm1 = vcmp.eq.s32.totalorder %v250_v42, %v257_v50  ;;  %vm259_vm2 = vcmp.eq.s32.totalorder %v251_v47, %v257_v50 }
 0x102   :  { %v223_v44 = vpop.f32.mrf.mxu0 }
 0x103   :  { %v233_v45 = vmul.f32 %v231_v40, %v223_v44 }
 0x104   :  { %v225_v48 = vpop.f32.mrf.mxu0 }
 0x105   :  { %v246_v49 = vmul.f32 %v239_v43, %v233_v45  ;;  %v234_v51 = vmul.f32 %v231_v40, %v225_v48 }
 0x107   :  { %v247_v52 = vmul.f32 %v243_v46, %v234_v51  ;;  %v260_v53 = vsel %vm258_vm1, %v246_v49, 0.0 }
 0x109   :  { %v261_v54 = vsel %vm259_vm2, %v247_v52, 0.0 }
 0x10a   :  { %v262_v55 = vadd.f32 %v261_v54, %v260_v53 }
 0x10c   :  { %263 = vadd.xlane.f32.xlu1 %v262_v55 }
 0x195   :  { %v264_v56 = vpop.xlane.xlu1 %263 }
 0x196   :  { %v265_v57 = vmul.f32 0.015625, %v264_v56 }
 0x198   :  { %v266_v58 = vmul.f32 %v265_v57, %v265_v57  ;;  %v276_v2 = vmul.f32 0.87758255, %v265_v57  ;;  %v334_v5 = vadd.f32 -0.23971277, %v265_v57  ;;  %vm279_vm5 = vcmp.gt.f32.partialorder %v265_v57, -0.87758255 }
 0x19a   :  { %v267_v59 = vsub.f32 1.0, %v266_v58 }
 0x19c   :  { %v268_v60 = vmax.f32 %v267_v59, 0.0 }
 0x19e   :  { %372 = vrsqrt.f32 %v268_v60  ;;  %vm271_vm3 = vcmp.eq.f32.partialorder %v268_v60, inf  ;;  %v274_v63 = vand.u32 2147483648, %v268_v60  ;;  %vm273_vm4 = vcmp.eq.f32.partialorder %v268_v60, 0.0 }
 0x1ab   :  { %v373_v61 = vpop.eup %372 }
 0x1ac   :  { %v270_v62 = vmul.f32 %v373_v61, %v268_v60 }
 0x1ae   :  { %v272_v0 = vsel %vm271_vm3, %v268_v60, %v270_v62 }
 0x1af   :  { %v275_v1 = vsel %vm273_vm4, %v274_v63, %v272_v0 }
 0x1b0   :  { %v277_v3 = vmul.f32 0.47942555, %v275_v1 }
 0x1b2   :  { %v278_v4 = vsub.f32 %v276_v2, %v277_v3 }
 0x1b4   :  { %v281_v6 = vsel %vm279_vm5, %v278_v4, %v334_v5 }
 0x1b5   :  { %v282_v7 = vmul.f32 64.0, %v281_v6 }
 0x1b7   :  { %v283_v8 = vsel %vm258_vm1, %v282_v7, %v246_v49  ;;  %v284_v9 = vsel %vm259_vm2, %v282_v7, %v247_v52 }
 0x1b8   :  { %285 = vst [vmem:[#allocation2] sm:$0xff] %v283_v8  ;;  %286 = vst [vmem:[#allocation2 + $0x8] sm:$0xff] %v284_v9 }
 0x1b9   :  { %385 = shalt.err (!%p382_p4)
}
 0x1ba   :  { %296 = dma.vmem_to_hbm [thread:$0]  %s294_s2, 256, %s582_s5, [#allocation3]  }
 0x1bb   :  { %394 = dma.done.wait [#allocation3], 256  }
 0x1bc   :  { %395 = vsyncadd [#allocation3], 4294967040 }
 0x1bd   :  { %300 = vsyncpa [#allocation3], 1 }

</bundles_post_ra>
